<compile_context>
chip_gen: v6e
topology: v6e:2x2x1
jax: 0.10.0
libtpu: 0.0.40
codegen_flags: <defaults>
</compile_context>

<pallas_src>
import functools

import jax
import jax.numpy as jnp
from jax import lax
from jax.experimental import pallas as pl
from jax.experimental.pallas import tpu as pltpu


# ----------------------------------------------------------------------------
# Pallas kernels
# ----------------------------------------------------------------------------

def _stem_kernel(x_ref, w_ref, b_ref, g_ref, beta_ref, o_ref, *, k, eps):
    """fcs[0] & positional_encoding (two dots on a leading-axis-stacked bf16 weight)
    + mid_point + HypLayerNorm + HypActivation(ReLU). Output = [time | space] via
    two slice stores (no lane-axis concatenate)."""
    x = x_ref[...]
    xb = x.astype(jnp.bfloat16)
    w = w_ref[...]                                   # [2, Din, ds] bf16 (fc0, pos-enc)
    b = b_ref[...]                                   # [2, 1, ds]  f32
    s1 = jnp.dot(xb, w[0], preferred_element_type=jnp.float32) + b[0]
    s2 = jnp.dot(xb, w[1], preferred_element_type=jnp.float32) + b[1]
    t1 = jnp.sqrt(jnp.sum(s1 * s1, axis=-1, keepdims=True) + k)
    t2 = jnp.sqrt(jnp.sum(s2 * s2, axis=-1, keepdims=True) + k)
    # mid_point of the two hyperbolic points (epsilon = 1.0)
    ave_t = (t1 + t2) * 0.5
    ave_s = (s1 + s2) * 0.5
    inner = jnp.sum(ave_s * ave_s, axis=-1, keepdims=True) - ave_t * ave_t
    # NOTE: the 1e-8 clamp only differs from the reference in the degenerate
    # near-light-cone case |<ave,ave>_L| -> 0.
    mid_s = (k ** 0.5) * ave_s * lax.rsqrt(jnp.maximum(jnp.abs(inner), 1e-8))
    # HypLayerNorm + HypActivation on the space part, time recomputed once.
    mu = jnp.mean(mid_s, axis=-1, keepdims=True)
    var = jnp.mean((mid_s - mu) ** 2, axis=-1, keepdims=True)
    s = (mid_s - mu) * lax.rsqrt(var + eps) * g_ref[...] + beta_ref[...]
    s = jnp.maximum(s, 0.0)
    t = jnp.sqrt(jnp.sum(s * s, axis=-1, keepdims=True) + k)
    o_ref[:, 0:1] = t
    o_ref[:, 1:] = s


def _layer_kernel(x_ref, wqkv_ref, bqkv_ref, wvm_ref, bvm_ref, g_ref, beta_ref,
                  w0_ref, b0_ref, w1_ref, b1_ref, wL_ref, bL_ref, o_ref, *,
                  k, num_heads, power_k, norm_scale, eps, fuse_final):
    """One fully fused TransConv layer for one batch element:
       TransConvLayer (linear-focused attention) + residual mid_point + LN + ReLU
       + LorentzMLP (+ fcs[-1] when this is the last layer).
       Time/space parts are kept split inside the kernel; each HypLinear folds the
       input's time column as a rank-1 update, so there is no lane concatenate."""
    x = x_ref[...]                                   # [N, D] f32 (squeezed batch dim)
    x_t = x[:, 0:1]
    x_s = x[:, 1:]
    xb = x.astype(jnp.bfloat16)

    wqkv = wqkv_ref[...]                             # [3H, D, ds] bf16 (Q.. | K.. | V..)
    bqkv = bqkv_ref[...]                             # [3H, 1, ds] f32
    ns = abs(norm_scale)
    h = num_heads

    def phi(z):                                      # focused feature map fp()
        z = (jnp.maximum(z, 0.0) + 1e-6) / ns
        nz = jnp.sqrt(jnp.sum(z * z, axis=-1, keepdims=True))
        zp = z * z if power_k == 2.0 else z ** power_k
        inv_nzp = lax.rsqrt(jnp.sum(zp * zp, axis=-1, keepdims=True))
        return (nz * inv_nzp) * zp

    attn_acc = None
    v_acc = None
    for i in range(h):                               # static unroll, H is small
        q_i = jnp.dot(xb, wqkv[i], preferred_element_type=jnp.float32) + bqkv[i]
        k_i = jnp.dot(xb, wqkv[h + i], preferred_element_type=jnp.float32) + bqkv[h + i]
        v_i = jnp.dot(xb, wqkv[2 * h + i], preferred_element_type=jnp.float32) + bqkv[2 * h + i]
        pq = phi(q_i)
        pk = phi(k_i)
        # pk^T @ v without an XLU transpose: contract the leading N axis directly.
        ktv = lax.dot_general(pk.astype(jnp.bfloat16), v_i.astype(jnp.bfloat16),
                              dimension_numbers=(((0,), (0,)), ((), ())),
                              preferred_element_type=jnp.float32)        # [ds, ds]
        num = jnp.dot(pq.astype(jnp.bfloat16), ktv.astype(jnp.bfloat16),
                      preferred_element_type=jnp.float32)                # [N, ds]
        ksum = jnp.sum(pk, axis=0, keepdims=True)                        # [1, ds]
        den = jnp.sum(pq * ksum, axis=-1, keepdims=True) + 1e-6          # [N, 1]
        attn_i = num / den                    # exact divide (den can be ~1e-6)
        attn_acc = attn_i if attn_acc is None else attn_acc + attn_i
        v_acc = v_i if v_acc is None else v_acc + v_i

    inv_h = 1.0 / h
    attn_mean = attn_acc * inv_h
    v_mean = v_acc * inv_h
    # v_map_mlp is a plain (affine) nn.Linear -> hoisting out of the head loop is exact.
    vss = jnp.dot(v_mean.astype(jnp.bfloat16), wvm_ref[...],
                  preferred_element_type=jnp.float32) + bvm_ref[...]
    out_s = attn_mean + vss
    out_t = jnp.sqrt(jnp.sum(out_s * out_s, axis=-1, keepdims=True) + k)

    # residual: mid_point(stack(attn_output, layer_input))
    ave_t = (out_t + x_t) * 0.5
    ave_s = (out_s + x_s) * 0.5
    inner = jnp.sum(ave_s * ave_s, axis=-1, keepdims=True) - ave_t * ave_t
    mid_s = (k ** 0.5) * ave_s * lax.rsqrt(jnp.maximum(jnp.abs(inner), 1e-8))

    # HypLayerNorm + HypActivation (ReLU), time recomputed once.
    mu = jnp.mean(mid_s, axis=-1, keepdims=True)
    var = jnp.mean((mid_s - mu) ** 2, axis=-1, keepdims=True)
    a_s = (mid_s - mu) * lax.rsqrt(var + eps) * g_ref[...] + beta_ref[...]
    a_s = jnp.maximum(a_s, 0.0)
    a_t = jnp.sqrt(jnp.sum(a_s * a_s, axis=-1, keepdims=True) + k)

    def hyp_linear_split(s_part, t_part, w_ref, b_ref):
        """HypLinear on a (time, space)-split input: s @ W[1:] + t * W[0:1] + b."""
        w = w_ref[...]                               # [D, ds] bf16
        ys = jnp.dot(s_part.astype(jnp.bfloat16), w[1:],
                     preferred_element_type=jnp.float32)
        ys = ys + t_part * w[0:1].astype(jnp.float32) + b_ref[...]
        yt = jnp.sqrt(jnp.sum(ys * ys, axis=-1, keepdims=True) + k)
        return yt, ys

    # LorentzMLP([euc, euc]): HypLinear -> +residual -> ReLU+time -> HypLinear -> +residual
    t1m, s1m = hyp_linear_split(a_s, a_t, w0_ref, b0_ref)
    h1_t = t1m + a_t
    h1_s = s1m + a_s
    h1a_s = jnp.maximum(h1_s, 0.0)
    h1a_t = jnp.sqrt(jnp.sum(h1a_s * h1a_s, axis=-1, keepdims=True) + k)
    t2m, s2m = hyp_linear_split(h1a_s, h1a_t, w1_ref, b1_ref)
    h2_t = t2m + h1a_t                               # no activation on the last MLP layer
    h2_s = s2m + h1a_s

    if fuse_final:                                   # fcs[-1] fused into the last layer
        fo_t, fo_s = hyp_linear_split(h2_s, h2_t, wL_ref, bL_ref)
        o_ref[:, 0:1] = fo_t
        o_ref[:, 1:] = fo_s
    else:
        o_ref[:, 0:1] = h2_t
        o_ref[:, 1:] = h2_s


# ----------------------------------------------------------------------------
# Wrappers
# ----------------------------------------------------------------------------

def _row_tile(m):
    """Largest row tile (multiple of 8) dividing m. Only split into >=2 grid steps
    (useful for v7x's 2 TensorCores) when the tile stays >= 256 rows, so single-TC
    v5e/v6e never pay extra per-step overhead for tiny tiles."""
    best = None
    for t in (2048, 1024, 512, 256, 128, 64, 32, 16, 8):
        if m % t == 0:
            if best is None:
                best = t
            if t >= 256 and m // t >= 2:
                return t
    return best if best is not None else m


def _vmem_limit_bytes():
    """Generation-aware scoped-VMEM ceiling (v5e/v6e: 128 MiB physical; v7x: 64 MiB)."""
    kind = ""
    try:
        kind = jax.devices()[0].device_kind.lower()
    except Exception:
        pass
    if ("v5" in kind) or ("v6" in kind):
        return 64 * 1024 * 1024
    return 48 * 1024 * 1024


def stem_forward(x, params, *, k=1.0, eps=1e-5):
    b, n, din = x.shape
    ds = params['stem_w'].shape[-1]
    d = ds + 1
    m = b * n
    tm = _row_tile(m)
    out = pl.pallas_call(
        functools.partial(_stem_kernel, k=k, eps=eps),
        out_shape=jax.ShapeDtypeStruct((m, d), jnp.float32),
        grid=(m // tm,),
        in_specs=[pl.BlockSpec((tm, din), lambda i: (i, 0)),
                  pl.BlockSpec((2, din, ds), lambda i: (0, 0, 0)),
                  pl.BlockSpec((2, 1, ds), lambda i: (0, 0, 0)),
                  pl.BlockSpec((1, ds), lambda i: (0, 0)),
                  pl.BlockSpec((1, ds), lambda i: (0, 0))],
        out_specs=pl.BlockSpec((tm, d), lambda i: (i, 0)),
        compiler_params=pltpu.CompilerParams(
            dimension_semantics=("parallel",),
            vmem_limit_bytes=_vmem_limit_bytes()),
    )(x.reshape(m, din), params['stem_w'], params['stem_b'],
      params['bn0_g'], params['bn0_b'])
    return out.reshape(b, n, d)


def layer_forward(x, lp, final_w, final_b, *, k=1.0, power_k=2.0, eps=1e-5,
                  fuse_final=False):
    b, n, d = x.shape
    ds = d - 1
    h = lp['num_heads']
    kern = functools.partial(
        _layer_kernel, k=k, num_heads=h, power_k=power_k,
        norm_scale=float(lp['norm_scale']), eps=eps, fuse_final=fuse_final)
    return pl.pallas_call(
        kern,
        out_shape=jax.ShapeDtypeStruct((b, n, d), jnp.float32),
        grid=(b,),
        in_specs=[pl.BlockSpec((None, n, d), lambda i: (i, 0, 0)),    # squeezed batch dim
                  pl.BlockSpec((3 * h, d, ds), lambda i: (0, 0, 0)),
                  pl.BlockSpec((3 * h, 1, ds), lambda i: (0, 0, 0)),
                  pl.BlockSpec((ds, ds), lambda i: (0, 0)),
                  pl.BlockSpec((1, ds), lambda i: (0, 0)),
                  pl.BlockSpec((1, ds), lambda i: (0, 0)),
                  pl.BlockSpec((1, ds), lambda i: (0, 0)),
                  pl.BlockSpec((d, ds), lambda i: (0, 0)),
                  pl.BlockSpec((1, ds), lambda i: (0, 0)),
                  pl.BlockSpec((d, ds), lambda i: (0, 0)),
                  pl.BlockSpec((1, ds), lambda i: (0, 0)),
                  pl.BlockSpec((d, ds), lambda i: (0, 0)),
                  pl.BlockSpec((1, ds), lambda i: (0, 0))],
        out_specs=pl.BlockSpec((None, n, d), lambda i: (i, 0, 0)),
        compiler_params=pltpu.CompilerParams(
            dimension_semantics=("parallel",),
            vmem_limit_bytes=_vmem_limit_bytes()),
    )(x, lp['wqkv'], lp['bqkv'], lp['wv'], lp['bv'], lp['bn_g'], lp['bn_b'],
      lp['mlp0_w'], lp['mlp0_b'], lp['mlp1_w'], lp['mlp1_b'],
      final_w, final_b)


# ----------------------------------------------------------------------------
# Parameter init (weights pre-stacked on leading axes and pre-cast to bf16)
# ----------------------------------------------------------------------------

def init_params(key, in_ch, euc, num_heads, num_layers):
    ds = euc - 1

    def lin(k_, din, dout, scale=0.2):
        kw, kb = jax.random.split(k_)
        w = jax.random.normal(kw, (din, dout), jnp.float32) * scale  # [Din, Dout] layout
        b = jax.random.normal(kb, (1, dout), jnp.float32) * 0.01
        return w, b

    keys = jax.random.split(key, 3 + num_layers)
    params = {}
    fc0_w, fc0_b = lin(keys[0], in_ch, ds)
    pos_w, pos_b = lin(keys[1], in_ch, ds)
    # Stack fc0 / pos-enc on a LEADING axis so in-kernel branch slices are free views.
    params['stem_w'] = jnp.stack([fc0_w, pos_w], axis=0).astype(jnp.bfloat16)  # [2,in_ch,ds]
    params['stem_b'] = jnp.stack([fc0_b, pos_b], axis=0)                       # [2,1,ds]
    params['bn0_g'] = jnp.ones((1, ds), jnp.float32)
    params['bn0_b'] = jnp.zeros((1, ds), jnp.float32)
    fcL_w, fcL_b = lin(keys[2], euc, ds)
    params['fcL_w'] = fcL_w.astype(jnp.bfloat16)
    params['fcL_b'] = fcL_b

    layers = []
    for li in range(num_layers):
        lkeys = jax.random.split(keys[3 + li], 3 * num_heads + 3)
        lp = {'num_heads': num_heads}
        qw = [lin(lkeys[3 * hh + 0], euc, ds) for hh in range(num_heads)]
        kw = [lin(lkeys[3 * hh + 1], euc, ds) for hh in range(num_heads)]
        vw = [lin(lkeys[3 * hh + 2], euc, ds) for hh in range(num_heads)]
        # [3H, euc, ds] = [Q_0..Q_{H-1} | K_0.. | V_0..] stacked on the leading axis.
        lp['wqkv'] = jnp.stack([w for w, _ in qw] + [w for w, _ in kw]
                               + [w for w, _ in vw], axis=0).astype(jnp.bfloat16)
        lp['bqkv'] = jnp.stack([b for _, b in qw] + [b for _, b in kw]
                               + [b for _, b in vw], axis=0)                   # [3H,1,ds]
        wv, bv = lin(lkeys[3 * num_heads], ds, ds)                             # v_map_mlp
        lp['wv'] = wv.astype(jnp.bfloat16)
        lp['bv'] = bv
        m0w, m0b = lin(lkeys[3 * num_heads + 1], euc, ds)
        m1w, m1b = lin(lkeys[3 * num_heads + 2], euc, ds)
        lp['mlp0_w'] = m0w.astype(jnp.bfloat16)
        lp['mlp0_b'] = m0b
        lp['mlp1_w'] = m1w.astype(jnp.bfloat16)
        lp['mlp1_b'] = m1b
        lp['bn_g'] = jnp.ones((1, ds), jnp.float32)
        lp['bn_b'] = jnp.zeros((1, ds), jnp.float32)
        lp['norm_scale'] = 1.0
        layers.append(lp)
    params['layers'] = layers
    return params


def trans_conv_forward(x_input, params, *, power_k=2.0, k=1.0):
    """x_input: [B, N, in_channels] hyperbolic point cloud (x_manifold='hyp')."""
    # fcs[0] + positional encoding + mid_point + bns[0] + activation (dropout=0)
    x = stem_forward(x_input, params, k=k)
    n_layers = len(params['layers'])
    for li, lp in enumerate(params['layers']):
        # TransConvLayer + residual mid_point + bn + act + LorentzMLP
        # (+ fcs[-1] fused into the last layer) — ONE pallas_call per layer.
        x = layer_forward(x, lp, params['fcL_w'], params['fcL_b'],
                          k=k, power_k=power_k, fuse_final=(li == n_layers - 1))
    return x


if __name__ == "__main__":
    B, N = 2, 8
    IN_CH, EUC = 8, 8          # channel counts include the Lorentz time coordinate
    HEADS, LAYERS = 2, 1

    key = jax.random.PRNGKey(0)
    kx, kp = jax.random.split(key)

    # Valid hyperbolic input: time = sqrt(|space|^2 + k)
    x_space = jax.random.normal(kx, (B, N, IN_CH - 1), jnp.float32)
    x_time = jnp.sqrt(jnp.sum(x_space * x_space, axis=-1, keepdims=True) + 1.0)
    x_input = jnp.concatenate([x_time, x_space], axis=-1)            # [B, N, IN_CH]

    params = init_params(kp, IN_CH, EUC, HEADS, LAYERS)

    out = trans_conv_forward(x_input, params)
    out = jax.block_until_ready(out)

    assert out.shape == (B, N, EUC), out.shape
    assert bool(jnp.all(jnp.isfinite(out)))
    print("KERNEL_OK")
</pallas_src>

<mosaic_0001>
module attributes {stable_mosaic.version = 11 : i64} {
  func.func @_stem_kernel(%arg0: i32, %arg1: memref<16x8xf32, #tpu.memory_space<vmem>>, %arg2: memref<2x8x7xbf16, #tpu.memory_space<vmem>>, %arg3: memref<2x1x7xf32, #tpu.memory_space<vmem>>, %arg4: memref<1x7xf32, #tpu.memory_space<vmem>>, %arg5: memref<1x7xf32, #tpu.memory_space<vmem>>, %arg6: memref<16x8xf32, #tpu.memory_space<vmem>>) attributes {dimension_semantics = [#tpu.dimension_semantics<parallel>], iteration_bounds = array<i64: 1>, scalar_prefetch = 0 : i64, scratch_operands = 0 : i64, tpu.core_type = #tpu.core_type<tc>, window_params = [{transform_indices = @transform_0, window_bounds = array<i64: 16, 8>}, {pipeline_mode = #tpu.pipeline_mode<synchronous>, transform_indices = @transform_1, window_bounds = array<i64: 2, 8, 7>}, {pipeline_mode = #tpu.pipeline_mode<synchronous>, transform_indices = @transform_2, window_bounds = array<i64: 2, 1, 7>}, {pipeline_mode = #tpu.pipeline_mode<synchronous>, transform_indices = @transform_3, window_bounds = array<i64: 1, 7>}, {pipeline_mode = #tpu.pipeline_mode<synchronous>, transform_indices = @transform_4, window_bounds = array<i64: 1, 7>}, {transform_indices = @transform_5, window_bounds = array<i64: 16, 8>}]} {
    %c0 = arith.constant 0 : index
    %c0_0 = arith.constant 0 : index
    %0 = vector.load %arg1[%c0, %c0_0] : memref<16x8xf32, #tpu.memory_space<vmem>>, vector<16x8xf32>
    %1 = arith.truncf %0 : vector<16x8xf32> to vector<16x8xbf16>
    %c0_1 = arith.constant 0 : index
    %c0_2 = arith.constant 0 : index
    %c0_3 = arith.constant 0 : index
    %2 = vector.load %arg2[%c0_1, %c0_2, %c0_3] : memref<2x8x7xbf16, #tpu.memory_space<vmem>>, vector<2x8x7xbf16>
    %c0_4 = arith.constant 0 : index
    %c0_5 = arith.constant 0 : index
    %c0_6 = arith.constant 0 : index
    %3 = vector.load %arg3[%c0_4, %c0_5, %c0_6] : memref<2x1x7xf32, #tpu.memory_space<vmem>>, vector<2x1x7xf32>
    %4 = vector.extract_strided_slice %2 {offsets = [0, 0, 0], sizes = [1, 8, 7], strides = [1, 1, 1]} : vector<2x8x7xbf16> to vector<1x8x7xbf16>
    %5 = vector.shape_cast %4 : vector<1x8x7xbf16> to vector<8x7xbf16>
    %cst = arith.constant dense<0.000000e+00> : vector<16x7xf32>
    %6 = tpu.matmul %1, %5, %cst {dimension_numbers = #tpu.dot_dimension_numbers<[1], [0], [0], [1], [0, 0, 1, 1], [], []>} : vector<16x8xbf16>, vector<8x7xbf16>, vector<16x7xf32> -> vector<16x7xf32>
    %7 = vector.extract_strided_slice %3 {offsets = [0, 0, 0], sizes = [1, 1, 7], strides = [1, 1, 1]} : vector<2x1x7xf32> to vector<1x1x7xf32>
    %8 = vector.shape_cast %7 : vector<1x1x7xf32> to vector<1x7xf32>
    %9 = vector.broadcast %8 : vector<1x7xf32> to vector<16x7xf32>
    %10 = arith.addf %6, %9 : vector<16x7xf32>
    %11 = vector.extract_strided_slice %2 {offsets = [1, 0, 0], sizes = [1, 8, 7], strides = [1, 1, 1]} : vector<2x8x7xbf16> to vector<1x8x7xbf16>
    %12 = vector.shape_cast %11 : vector<1x8x7xbf16> to vector<8x7xbf16>
    %cst_7 = arith.constant dense<0.000000e+00> : vector<16x7xf32>
    %13 = tpu.matmul %1, %12, %cst_7 {dimension_numbers = #tpu.dot_dimension_numbers<[1], [0], [0], [1], [0, 0, 1, 1], [], []>} : vector<16x8xbf16>, vector<8x7xbf16>, vector<16x7xf32> -> vector<16x7xf32>
    %14 = vector.extract_strided_slice %3 {offsets = [1, 0, 0], sizes = [1, 1, 7], strides = [1, 1, 1]} : vector<2x1x7xf32> to vector<1x1x7xf32>
    %15 = vector.shape_cast %14 : vector<1x1x7xf32> to vector<1x7xf32>
    %16 = vector.broadcast %15 : vector<1x7xf32> to vector<16x7xf32>
    %17 = arith.addf %13, %16 : vector<16x7xf32>
    %18 = arith.mulf %10, %10 : vector<16x7xf32>
    %cst_8 = arith.constant dense<0.000000e+00> : vector<16xf32>
    %19 = vector.multi_reduction <add>, %18, %cst_8 [1] : vector<16x7xf32> to vector<16xf32>
    %20 = vector.shape_cast %19 : vector<16xf32> to vector<16x1xf32>
    %cst_9 = arith.constant 1.000000e+00 : f32
    %21 = vector.broadcast %cst_9 : f32 to vector<16x1xf32>
    %22 = arith.addf %20, %21 : vector<16x1xf32>
    %23 = math.sqrt %22 : vector<16x1xf32>
    %24 = arith.mulf %17, %17 : vector<16x7xf32>
    %cst_10 = arith.constant dense<0.000000e+00> : vector<16xf32>
    %25 = vector.multi_reduction <add>, %24, %cst_10 [1] : vector<16x7xf32> to vector<16xf32>
    %26 = vector.shape_cast %25 : vector<16xf32> to vector<16x1xf32>
    %cst_11 = arith.constant 1.000000e+00 : f32
    %27 = vector.broadcast %cst_11 : f32 to vector<16x1xf32>
    %28 = arith.addf %26, %27 : vector<16x1xf32>
    %29 = math.sqrt %28 : vector<16x1xf32>
    %30 = arith.addf %23, %29 : vector<16x1xf32>
    %cst_12 = arith.constant 5.000000e-01 : f32
    %31 = vector.broadcast %cst_12 : f32 to vector<16x1xf32>
    %32 = arith.mulf %30, %31 : vector<16x1xf32>
    %33 = arith.addf %10, %17 : vector<16x7xf32>
    %cst_13 = arith.constant 5.000000e-01 : f32
    %34 = vector.broadcast %cst_13 : f32 to vector<16x7xf32>
    %35 = arith.mulf %33, %34 : vector<16x7xf32>
    %36 = arith.mulf %35, %35 : vector<16x7xf32>
    %cst_14 = arith.constant dense<0.000000e+00> : vector<16xf32>
    %37 = vector.multi_reduction <add>, %36, %cst_14 [1] : vector<16x7xf32> to vector<16xf32>
    %38 = vector.shape_cast %37 : vector<16xf32> to vector<16x1xf32>
    %39 = arith.mulf %32, %32 : vector<16x1xf32>
    %40 = arith.subf %38, %39 : vector<16x1xf32>
    %cst_15 = arith.constant 1.000000e+00 : f32
    %41 = vector.broadcast %cst_15 : f32 to vector<16x7xf32>
    %42 = arith.mulf %41, %35 : vector<16x7xf32>
    %43 = math.absf %40 : vector<16x1xf32>
    %cst_16 = arith.constant 9.99999993E-9 : f32
    %44 = vector.broadcast %cst_16 : f32 to vector<16x1xf32>
    %45 = arith.maximumf %43, %44 : vector<16x1xf32>
    %46 = math.rsqrt %45 : vector<16x1xf32>
    %47 = vector.broadcast %46 : vector<16x1xf32> to vector<16x7xf32>
    %48 = arith.mulf %42, %47 : vector<16x7xf32>
    %cst_17 = arith.constant dense<0.000000e+00> : vector<16xf32>
    %49 = vector.multi_reduction <add>, %48, %cst_17 [1] : vector<16x7xf32> to vector<16xf32>
    %50 = vector.shape_cast %49 : vector<16xf32> to vector<16x1xf32>
    %cst_18 = arith.constant 7.000000e+00 : f32
    %51 = vector.broadcast %cst_18 : f32 to vector<16x1xf32>
    %52 = arith.divf %50, %51 : vector<16x1xf32>
    %53 = vector.broadcast %52 : vector<16x1xf32> to vector<16x7xf32>
    %54 = arith.subf %48, %53 : vector<16x7xf32>
    %55 = arith.mulf %54, %54 : vector<16x7xf32>
    %cst_19 = arith.constant dense<0.000000e+00> : vector<16xf32>
    %56 = vector.multi_reduction <add>, %55, %cst_19 [1] : vector<16x7xf32> to vector<16xf32>
    %57 = vector.shape_cast %56 : vector<16xf32> to vector<16x1xf32>
    %cst_20 = arith.constant 7.000000e+00 : f32
    %58 = vector.broadcast %cst_20 : f32 to vector<16x1xf32>
    %59 = arith.divf %57, %58 : vector<16x1xf32>
    %60 = vector.broadcast %52 : vector<16x1xf32> to vector<16x7xf32>
    %61 = arith.subf %48, %60 : vector<16x7xf32>
    %cst_21 = arith.constant 9.99999974E-6 : f32
    %62 = vector.broadcast %cst_21 : f32 to vector<16x1xf32>
    %63 = arith.addf %59, %62 : vector<16x1xf32>
    %64 = math.rsqrt %63 : vector<16x1xf32>
    %65 = vector.broadcast %64 : vector<16x1xf32> to vector<16x7xf32>
    %66 = arith.mulf %61, %65 : vector<16x7xf32>
    %c0_22 = arith.constant 0 : index
    %c0_23 = arith.constant 0 : index
    %67 = vector.load %arg4[%c0_22, %c0_23] : memref<1x7xf32, #tpu.memory_space<vmem>>, vector<1x7xf32>
    %68 = vector.broadcast %67 : vector<1x7xf32> to vector<16x7xf32>
    %69 = arith.mulf %66, %68 : vector<16x7xf32>
    %c0_24 = arith.constant 0 : index
    %c0_25 = arith.constant 0 : index
    %70 = vector.load %arg5[%c0_24, %c0_25] : memref<1x7xf32, #tpu.memory_space<vmem>>, vector<1x7xf32>
    %71 = vector.broadcast %70 : vector<1x7xf32> to vector<16x7xf32>
    %72 = arith.addf %69, %71 : vector<16x7xf32>
    %cst_26 = arith.constant 0.000000e+00 : f32
    %73 = vector.broadcast %cst_26 : f32 to vector<16x7xf32>
    %74 = arith.maximumf %72, %73 : vector<16x7xf32>
    %75 = arith.mulf %74, %74 : vector<16x7xf32>
    %cst_27 = arith.constant dense<0.000000e+00> : vector<16xf32>
    %76 = vector.multi_reduction <add>, %75, %cst_27 [1] : vector<16x7xf32> to vector<16xf32>
    %77 = vector.shape_cast %76 : vector<16xf32> to vector<16x1xf32>
    %cst_28 = arith.constant 1.000000e+00 : f32
    %78 = vector.broadcast %cst_28 : f32 to vector<16x1xf32>
    %79 = arith.addf %77, %78 : vector<16x1xf32>
    %80 = math.sqrt %79 : vector<16x1xf32>
    %c0_29 = arith.constant 0 : index
    %c0_30 = arith.constant 0 : index
    %81 = vector.load %arg6[%c0_29, %c0_30] : memref<16x8xf32, #tpu.memory_space<vmem>>, vector<16x1xf32>
    tpu.vector_store %arg6[%c0_29, %c0_30], %80 {strides = array<i32>} : memref<16x8xf32, #tpu.memory_space<vmem>>, vector<16x1xf32>,
    %c0_31 = arith.constant 0 : index
    %c1 = arith.constant 1 : index
    %82 = vector.load %arg6[%c0_31, %c1] : memref<16x8xf32, #tpu.memory_space<vmem>>, vector<16x7xf32>
    tpu.vector_store %arg6[%c0_31, %c1], %74 {strides = array<i32>} : memref<16x8xf32, #tpu.memory_space<vmem>>, vector<16x7xf32>,
    return
  }
  func.func @transform_0(%arg0: i32) -> (i32, i32) {
    %c0_i32 = arith.constant 0 : i32
    %c0_i32_0 = arith.constant 0 : i32
    return %arg0, %c0_i32 : i32, i32
  }
  func.func @transform_1(%arg0: i32) -> (i32, i32, i32) {
    %c0_i32 = arith.constant 0 : i32
    %c0_i32_0 = arith.constant 0 : i32
    %c0_i32_1 = arith.constant 0 : i32
    %c0_i32_2 = arith.constant 0 : i32
    return %c0_i32, %c0_i32_0, %c0_i32_1 : i32, i32, i32
  }
  func.func @transform_2(%arg0: i32) -> (i32, i32, i32) {
    %c0_i32 = arith.constant 0 : i32
    %c0_i32_0 = arith.constant 0 : i32
    %c0_i32_1 = arith.constant 0 : i32
    %c0_i32_2 = arith.constant 0 : i32
    return %c0_i32, %c0_i32_0, %c0_i32_1 : i32, i32, i32
  }
  func.func @transform_3(%arg0: i32) -> (i32, i32) {
    %c0_i32 = arith.constant 0 : i32
    %c0_i32_0 = arith.constant 0 : i32
    %c0_i32_1 = arith.constant 0 : i32
    return %c0_i32, %c0_i32_0 : i32, i32
  }
  func.func @transform_4(%arg0: i32) -> (i32, i32) {
    %c0_i32 = arith.constant 0 : i32
    %c0_i32_0 = arith.constant 0 : i32
    %c0_i32_1 = arith.constant 0 : i32
    return %c0_i32, %c0_i32_0 : i32, i32
  }
  func.func @transform_5(%arg0: i32) -> (i32, i32) {
    %c0_i32 = arith.constant 0 : i32
    %c0_i32_0 = arith.constant 0 : i32
    return %arg0, %c0_i32 : i32, i32
  }
}

</mosaic_0001>

<bundles_post_ra>
// kernel: tpu_custom_call.1
= control target key start
LH: loop header
LB: loop body
LE: loop exit
PB: predicated region body
PF: predicated region fallthrough
CT: control target
= control target key end

     0   :  { %vm38_vm0 = vcmask 1043456   ;;  %v344_v0 = vmov 0.0   ;;  %vm345_vm1 = vmmov 0   ;;  %vm34_vm2 = vcmask 64512   ;;  %s435_s1 = inlined_call_operand.vmem [shape: bf16[2,8,7], index: 1, kind: input, shape index: {}]   ;;  %s436_s0 = inlined_call_operand.vmem [shape: f32[16,8], index: 0, kind: input, shape index: {}]   ;;  %s437_s2 = inlined_call_operand.vmem [shape: f32[2,1,7], index: 2, kind: input, shape index: {}]   ;;  %s438_s3 = inlined_call_operand.vmem [shape: f32[1,7], index: 3, kind: input, shape index: {}]   ;;  %s439_s4 = inlined_call_operand.vmem [shape: f32[1,7], index: 4, kind: input, shape index: {}]   ;;  %s440_s5 = inlined_call_operand.vmem [shape: f32[16,8], index: 5, kind: output, shape index: {}]  }
   0x1   :  { %309 = vmatprep.subr.bf16.mxu0 %v344_v0  ;;  %315 = vmatprep.subr.bf16.mxu1 %v344_v0  ;;  %v24_v1 = vld [vmem:[%s435_s1] sm:$0xf]  ;;  %v25_v2 = vld [vmem:[%s435_s1 + $0x4] sm:$0xf]  ;;  %v22_v6 = vld [vmem:[%s436_s0 + $0x8] sm:$0xff]  ;;  %vm135_vm3 = vcmask 56320  }
   0x2   :  { %v21_v3 = vld [vmem:[%s436_s0] sm:$0xff]  ;;  %v40_v4 = vsel %vm38_vm0, %v24_v1, 0  ;;  %v90_v5 = vsel %vm38_vm0, %v25_v2, 0  ;;  %311 = vmatprep.mubr.msk.bf16.mxu0 %vm345_vm1, %v344_v0  ;;  %317 = vmatprep.mubr.msk.bf16.mxu1 %vm345_vm1, %v344_v0  ;;  %vm281_vm13 = vcmask 7168   ;;  %vm292_vm15 = vcmask 64520  }
   0x3   :  { %310 = vmatpush3.bf16.msra.mxu0 %v40_v4  ;;  %316 = vmatpush3.bf16.msra.mxu1 %v90_v5  ;;  %v23_v7 = vpack.c.bf16 %v22_v6, %v21_v3  ;;  %v299_v8 = vld [vmem:[%s437_s2] ss:$0 sm:$0xff]  ;;  %v301_v9 = vld [vmem:[%s437_s2 + $0x1] ss:$0 sm:$0xff] }
   0x6   :  { %312 = vmatmul.mubr.msk.bf16.vlgmr.msra.gmra.mxu0 %vm34_vm2, %v23_v7  ;;  %318 = vmatmul.mubr.msk.bf16.vlgmr.msra.gmra.mxu1 %vm34_vm2, %v23_v7 }
  0xc6   :  { %v76_v10 = vpop.f32.mrf.mxu0  ;;  %v126_v11 = vpop.f32.mrf.mxu1 }
  0xc7   :  { %v77_v12 = vadd.f32 %v299_v8, %v76_v10  ;;  %v127_v13 = vadd.f32 %v301_v9, %v126_v11 }
  0xc8   :  { %v313_v14 = vpop.f32.mrf.mxu0  ;;  %v319_v15 = vpop.f32.mrf.mxu1 }
  0xc9   :  { %v186_v16 = vadd.f32 %v127_v13, %v77_v12  ;;  %v158_v17 = vmul.f32 %v127_v13, %v127_v13  ;;  %v133_v18 = vmul.f32 %v77_v12, %v77_v12 }
  0xca   :  { %v79_v19 = vpop.f32.mrf.mxu0  ;;  %v129_v20 = vpop.f32.mrf.mxu1 }
  0xcb   :  { %v80_v21 = vadd.f32 %v299_v8, %v79_v19  ;;  %v130_v22 = vadd.f32 %v301_v9, %v129_v20  ;;  %v160_v23 = vsel %vm135_vm3, %v158_v17, 0.0  ;;  %v396_v24 = vmul.f32 0.5, %v186_v16 }
  0xcc   :  { %161 = vadd.xlane.f32.xlu1 %v160_v23  ;;  %v320_v25 = vpop.f32.mrf.mxu1  ;;  %v136_v26 = vsel %vm135_vm3, %v133_v18, 0.0  ;;  %v314_v27 = vpop.f32.mrf.mxu0 }
  0xcd   :  { %v187_v28 = vadd.f32 %v130_v22, %v80_v21  ;;  %137 = vadd.xlane.f32.xlu0 %v136_v26  ;;  %v159_v29 = vmul.f32 %v130_v22, %v130_v22  ;;  %v134_v30 = vmul.f32 %v80_v21, %v80_v21  ;;  %v190_v34 = vmul.f32 %v396_v24, %v396_v24 }
  0xcf   :  { %v399_v31 = vmul.f32 0.5, %v187_v28  ;;  %v163_v32 = vsel %vm135_vm3, %v159_v29, 0.0  ;;  %v139_v33 = vsel %vm135_vm3, %v134_v30, 0.0  ;;  %v192_v37 = vsel %vm135_vm3, %v190_v34, 0.0 }
  0xd0   :  { %164 = vadd.xlane.f32.xlu1 %v163_v32 }
  0xd1   :  { %140 = vadd.xlane.f32.xlu0 %v139_v33  ;;  %v191_v35 = vmul.f32 %v399_v31, %v399_v31 }
  0xd3   :  { %v195_v36 = vsel %vm135_vm3, %v191_v35, 0.0 }
  0xd4   :  { %196 = vadd.xlane.f32.xlu1 %v195_v36 }
  0xd5   :  { %193 = vadd.xlane.f32.xlu0 %v192_v37 }
 0x155   :  { %v162_v38 = vpop.xlane.xlu1 %161 }
 0x156   :  { %v166_v39 = vadd.f32 1.0, %v162_v38  ;;  %v138_v40 = vpop.xlane.xlu0 %137 }
 0x157   :  { %v142_v41 = vadd.f32 1.0, %v138_v40 }
 0x158   :  { %324 = vrsqrt.f32 %v166_v39  ;;  %vm170_vm4 = vcmp.eq.f32.partialorder %v166_v39, inf  ;;  %v173_v50 = vand.u32 2147483648, %v166_v39  ;;  %vm172_vm6 = vcmp.eq.f32.partialorder %v166_v39, 0.0 }
 0x159   :  { %326 = vrsqrt.f32 %v142_v41  ;;  %v165_v42 = vpop.xlane.xlu1 %164  ;;  %vm146_vm5 = vcmp.eq.f32.partialorder %v142_v41, inf  ;;  %v149_v51 = vand.u32 2147483648, %v142_v41  ;;  %vm148_vm7 = vcmp.eq.f32.partialorder %v142_v41, 0.0 }
 0x15a   :  { %v167_v43 = vadd.f32 1.0, %v165_v42  ;;  %v141_v44 = vpop.xlane.xlu0 %140 }
 0x15b   :  { %v143_v45 = vadd.f32 1.0, %v141_v44 }
 0x15c   :  { %328 = vrsqrt.f32 %v167_v43  ;;  %vm177_vm8 = vcmp.eq.f32.partialorder %v167_v43, inf  ;;  %v180_v59 = vand.u32 2147483648, %v167_v43  ;;  %vm179_vm9 = vcmp.eq.f32.partialorder %v167_v43, 0.0 }
 0x15d   :  { %330 = vrsqrt.f32 %v143_v45  ;;  %vm153_vm10 = vcmp.eq.f32.partialorder %v143_v45, inf  ;;  %v156_v63 = vand.u32 2147483648, %v143_v45  ;;  %vm155_vm11 = vcmp.eq.f32.partialorder %v143_v45, 0.0  ;;  %v197_v11 = vpop.xlane.xlu1 %196 }
 0x15e   :  { %v194_v6 = vpop.xlane.xlu0 %193 }
 0x165   :  { %v325_v46 = vpop.eup %324 }
 0x166   :  { %v327_v47 = vpop.eup %326  ;;  %v169_v48 = vmul.f32 %v325_v46, %v166_v39 }
 0x167   :  { %v145_v49 = vmul.f32 %v327_v47, %v142_v41 }
 0x168   :  { %v171_v52 = vsel %vm170_vm4, %v166_v39, %v169_v48  ;;  %v303_v39 = vld [vmem:[%s438_s3] ss:$0 sm:$0xff]  ;;  %s346_s3 = smov 1  }
 0x169   :  { %v329_v53 = vpop.eup %328  ;;  %v147_v54 = vsel %vm146_vm5, %v142_v41, %v145_v49  ;;  %v174_v55 = vsel %vm172_vm6, %v173_v50, %v171_v52  ;;  %v304_v41 = vld [vmem:[%s439_s4] ss:$0 sm:$0xff] }
 0x16a   :  { %v331_v56 = vpop.eup %330  ;;  %v176_v57 = vmul.f32 %v329_v53, %v167_v43  ;;  %v150_v58 = vsel %vm148_vm7, %v149_v51, %v147_v54 }
 0x16b   :  { %v152_v60 = vmul.f32 %v331_v56, %v143_v45  ;;  %v182_v61 = vadd.f32 %v174_v55, %v150_v58 }
 0x16c   :  { %v178_v62 = vsel %vm177_vm8, %v167_v43, %v176_v57 }
 0x16d   :  { %v181_v0 = vsel %vm179_vm9, %v180_v59, %v178_v62  ;;  %v154_v1 = vsel %vm153_vm10, %v143_v45, %v152_v60  ;;  %v184_v2 = vmul.f32 0.5, %v182_v61 }
 0x16e   :  { %v157_v3 = vsel %vm155_vm11, %v156_v63, %v154_v1 }
 0x16f   :  { %v183_v4 = vadd.f32 %v181_v0, %v157_v3  ;;  %v198_v5 = vmul.f32 %v184_v2, %v184_v2 }
 0x171   :  { %v185_v7 = vmul.f32 0.5, %v183_v4  ;;  %v200_v8 = vsub.f32 %v194_v6, %v198_v5 }
 0x173   :  { %v199_v9 = vmul.f32 %v185_v7, %v185_v7  ;;  %v202_v10 = vand.u32 2147483647, %v200_v8 }
 0x175   :  { %v201_v12 = vsub.f32 %v197_v11, %v199_v9  ;;  %v204_v13 = vmax.f32 %v202_v10, 1e-08 }
 0x177   :  { %v203_v14 = vand.u32 2147483647, %v201_v12  ;;  %332 = vrsqrt.f32 %v204_v13 }
 0x179   :  { %v205_v15 = vmax.f32 %v203_v14, 1e-08 }
 0x17b   :  { %334 = vrsqrt.f32 %v205_v15 }
 0x184   :  { %v333_v16 = vpop.eup %332 }
 0x185   :  { %v208_v17 = vmul.f32 %v333_v16, %v396_v24 }
 0x187   :  { %v210_v18 = vsel %vm135_vm3, %v208_v17, 0.0 }
 0x188   :  { %v335_v19 = vpop.eup %334  ;;  %211 = vadd.xlane.f32.xlu0 %v210_v18 }
 0x189   :  { %v209_v20 = vmul.f32 %v335_v19, %v399_v31 }
 0x18b   :  { %v213_v21 = vsel %vm135_vm3, %v209_v20, 0.0 }
 0x18c   :  { %214 = vadd.xlane.f32.xlu1 %v213_v21 }
 0x211   :  { %v212_v22 = vpop.xlane.xlu0 %211 }
 0x212   :  { %v217_v23 = vmul.f32 0.14285715, %v212_v22 }
 0x214   :  { %v219_v25 = vsub.f32 %v208_v17, %v217_v23 }
 0x215   :  { %v215_v26 = vpop.xlane.xlu1 %214 }
 0x216   :  { %v218_v27 = vmul.f32 0.14285715, %v215_v26  ;;  %v221_v28 = vmul.f32 %v219_v25, %v219_v25 }
 0x218   :  { %v220_v29 = vsub.f32 %v209_v20, %v218_v27  ;;  %v223_v30 = vsel %vm135_vm3, %v221_v28, 0.0 }
 0x219   :  { %224 = vadd.xlane.f32.xlu0 %v223_v30 }
 0x21a   :  { %v222_v24 = vmul.f32 %v220_v29, %v220_v29 }
 0x21c   :  { %v226_v32 = vsel %vm135_vm3, %v222_v24, 0.0 }
 0x21d   :  { %227 = vadd.xlane.f32.xlu1 %v226_v32 }
 0x2a2   :  { %v225_v33 = vpop.xlane.xlu0 %224 }
 0x2a3   :  { %v229_v34 = vmul.f32 0.14285715, %v225_v33 }
 0x2a5   :  { %v231_v31 = vadd.f32 1e-05, %v229_v34 }
 0x2a6   :  { %v228_v35 = vpop.xlane.xlu1 %227 }
 0x2a7   :  { %336 = vrsqrt.f32 %v231_v31  ;;  %v230_v36 = vmul.f32 0.14285715, %v228_v35 }
 0x2a9   :  { %v232_v37 = vadd.f32 1e-05, %v230_v36 }
 0x2ab   :  { %338 = vrsqrt.f32 %v232_v37 }
 0x2b4   :  { %v337_v38 = vpop.eup %336 }
 0x2b5   :  { %v235_v40 = vmul.f32 %v337_v38, %v219_v25 }
 0x2b7   :  { %v244_v42 = vmul.f32 %v303_v39, %v235_v40 }
 0x2b8   :  { %v339_v43 = vpop.eup %338 }
 0x2b9   :  { %v253_v44 = vadd.f32 %v304_v41, %v244_v42  ;;  %v236_v45 = vmul.f32 %v339_v43, %v220_v29 }
 0x2bb   :  { %v255_v46 = vmax.f32 %v253_v44, 0.0  ;;  %v245_v47 = vmul.f32 %v303_v39, %v236_v45 }
 0x2bd   :  { %v257_v48 = vmul.f32 %v255_v46, %v255_v46  ;;  %v254_v49 = vadd.f32 %v304_v41, %v245_v47 }
 0x2bf   :  { %v259_v50 = vsel %vm135_vm3, %v257_v48, 0.0  ;;  %v256_v51 = vmax.f32 %v254_v49, 0.0 }
 0x2c0   :  { %260 = vadd.xlane.f32.xlu0 %v259_v50 }
 0x2c1   :  { %v258_v52 = vmul.f32 %v256_v51, %v256_v51 }
 0x2c3   :  { %v262_v53 = vsel %vm135_vm3, %v258_v52, 0.0 }
 0x2c4   :  { %263 = vadd.xlane.f32.xlu1 %v262_v53 }
 0x2d5   :  { %288 = vrot.lane.b32.xlu1 %v256_v51, %s346_s3 }
 0x2d6   :  { %286 = vrot.lane.b32.xlu0 %v255_v46, %s346_s3 }
 0x349   :  { %v261_v54 = vpop.xlane.xlu0 %260 }
 0x34a   :  { %v265_v55 = vadd.f32 1.0, %v261_v54 }
 0x34c   :  { %340 = vrsqrt.f32 %v265_v55  ;;  %vm269_vm12 = vcmp.eq.f32.partialorder %v265_v55, inf  ;;  %v272_v60 = vand.u32 2147483648, %v265_v55  ;;  %vm271_vm14 = vcmp.eq.f32.partialorder %v265_v55, 0.0 }
 0x34d   :  { %v264_v56 = vpop.xlane.xlu1 %263  ;;  %v287_v0 = vpop.permute.xlu0 %286 }
 0x34e   :  { %v266_v57 = vadd.f32 1.0, %v264_v56 }
 0x350   :  { %342 = vrsqrt.f32 %v266_v57  ;;  %vm276_vm0 = vcmp.eq.f32.partialorder %v266_v57, inf  ;;  %v279_v2 = vand.u32 2147483648, %v266_v57  ;;  %vm278_vm1 = vcmp.eq.f32.partialorder %v266_v57, 0.0 }
 0x351   :  { %v289_v5 = vpop.permute.xlu1 %288 }
 0x359   :  { %v341_v58 = vpop.eup %340 }
 0x35a   :  { %v268_v59 = vmul.f32 %v341_v58, %v265_v55 }
 0x35c   :  { %v270_v61 = vsel %vm269_vm12, %v265_v55, %v268_v59 }
 0x35d   :  { %v343_v62 = vpop.eup %342  ;;  %v273_v63 = vsel %vm271_vm14, %v272_v60, %v270_v61 }
 0x35e   :  { %282 = vst.msk [vmem:[%s440_s5] sm:$0xff] %vm281_vm13, %v273_v63  ;;  %v275_v1 = vmul.f32 %v343_v62, %v266_v57 }
 0x35f   :  { %293 = vst.msk [vmem:[%s440_s5] sm:$0xff] %vm292_vm15, %v287_v0 }
 0x360   :  { %v277_v3 = vsel %vm276_vm0, %v266_v57, %v275_v1 }
 0x361   :  { %v280_v4 = vsel %vm278_vm1, %v279_v2, %v277_v3 }
 0x362   :  { %283 = vst.msk [vmem:[%s440_s5 + $0x8] sm:$0xff] %vm281_vm13, %v280_v4 }
 0x363   :  { %294 = vst.msk [vmem:[%s440_s5 + $0x8] sm:$0xff] %vm292_vm15, %v289_v5 }

</bundles_post_ra>
